<compile_context>
chip_gen: v5e
topology: v5e:2x2
jax: 0.10.0
libtpu: 0.0.40
codegen_flags: <defaults>
</compile_context>

<pallas_src>
import jax
import jax.numpy as jnp
from jax.experimental import pallas as pl
from jax.experimental.pallas import tpu as pltpu

H = 128  # lane-padded hidden width


# -----------------------------------------------------------------------------
# Pallas kernel: processes one batch-tile (Bt batch elements) per grid step.
#   xcy_ref : (Bt*Nc, dim_x+dim_yc)   context inputs (features concatenated)
#   xt_ref  : (Bt*Nt, dim_x)          target inputs
#   comb_ref: (Bt*Nt, Bt*Nc)          block matrix, 1/Nc on matching batches
#   wf_ref  : (Kf, 128)               first-layer weights [we1 ; wq1] (N-padded)
#   w_ref   : (8, 128, 128)           [we2,we3,wq2,wq3,wd1z,wd1q,wd2,wd3] padded
#   b_ref   : (9, 128)                [be1,be2,be3,bq1,bq2,bq3,bd1,bd2,bd3]
#   out_ref : (Bt*Nt, 128)            lane-dense output (valid lanes: dim_yt)
# -----------------------------------------------------------------------------
def cnp_kernel(xcy_ref, xt_ref, comb_ref, wf_ref, w_ref, b_ref, out_ref):
    f32 = jnp.float32
    xcy = xcy_ref[...]          # (Mc, Kc)  Kc = dim_x + dim_yc (small)
    xt = xt_ref[...]            # (Mt, Kx)  Kx = dim_x (small)
    comb = comb_ref[...]        # (Mt, Mc)
    wf = wf_ref[...]            # (Kf, 128)
    kc = xcy.shape[1]

    def first_layer(x, w_off, b_idx):
        # Degenerate-K (K<=3) layer on the VPU: sum_k x[:,k] * W[k,:]  + bias
        acc = x[:, 0:1] * wf[w_off:w_off + 1, :]
        for k in range(1, x.shape[1]):
            acc = acc + x[:, k:k + 1] * wf[w_off + k:w_off + k + 1, :]
        return jnp.maximum(acc + b_ref[b_idx:b_idx + 1, :], 0.0)

    def dense(x, w_idx, b_idx, relu):
        y = (jnp.dot(x, w_ref[w_idx], preferred_element_type=f32)
             + b_ref[b_idx:b_idx + 1, :])
        return jnp.maximum(y, 0.0) if relu else y

    # ---- encoder(cat(xc, yc)) : (Mc, 128) ----------------------------------
    h = first_layer(xcy, 0, 0)          # we1 rows [0:kc), be1
    h = dense(h, 0, 1, True)            # we2, be2
    h = dense(h, 1, 2, False)           # we3, be3

    # ---- latent contribution to decoder layer 1, broadcast to target rows --
    # comb[b*Nt+t, b*Nc+c] = 1/Nc  =>  comb @ (h @ Wd1z) == repeat(mean(h_b) @ Wd1z)
    hz = jnp.dot(h, w_ref[4], preferred_element_type=f32)      # (Mc, 128)
    zproj = jnp.dot(comb, hz, preferred_element_type=f32)      # (Mt, 128)

    # ---- q = q_encoder(xt) : (Mt, 128) --------------------------------------
    q = first_layer(xt, kc, 3)          # wq1 rows [kc:kc+dim_x), bq1
    q = dense(q, 2, 4, True)            # wq2, bq2
    q = dense(q, 3, 5, False)           # wq3, bq3

    # ---- decoder(cat(z, q)) --------------------------------------------------
    d = jnp.maximum(jnp.dot(q, w_ref[5], preferred_element_type=f32)
                    + zproj + b_ref[6:7, :], 0.0)               # wd1q, bd1
    d = dense(d, 6, 7, True)            # wd2, bd2
    d = dense(d, 7, 8, False)           # wd3, bd3

    out_ref[...] = d.astype(out_ref.dtype)


# -----------------------------------------------------------------------------
# Batch-tile picker: feed the MXU a decent M, keep >=2 grid steps when possible
# (v7x has 2 TensorCores), respect (8,128) block-tiling constraints.
# -----------------------------------------------------------------------------
def _pick_batch_tile(B, Nc, Nt):
    target_rows = 512
    bt = max(1, target_rows // max(Nc, Nt, 1))
    bt = min(bt, B)
    if B >= 2:
        bt = min(bt, max(1, B // 2))
    while bt > 1 and B % bt != 0:
        bt -= 1
    if bt < B and ((bt * Nt) % 8 != 0 or (bt * Nc) % 8 != 0):
        bt = B  # single step; full-array blocks are always legal
    return bt


# -----------------------------------------------------------------------------
# Wrapper
# -----------------------------------------------------------------------------
def cnp_forward(xc, yc, xt, params, batch_tile=None):
    B, Nc, dim_x = xc.shape
    _, _, dim_yc = yc.shape
    _, Nt, _ = xt.shape
    dim_h = params["we2"].shape[0]
    dim_yt = params["wd3"].shape[1]
    f32 = jnp.float32

    bt = batch_tile if batch_tile is not None else _pick_batch_tile(B, Nc, Nt)
    assert B % bt == 0
    grid = (B // bt,)

    # ---- pack & pad weights (zeros propagate harmlessly through the MLPs) ----
    def padw(w):  # (k, n) -> (128, 128)
        return jnp.zeros((H, H), f32).at[:w.shape[0], :w.shape[1]].set(w)

    def padb(b):  # (1, n) -> (128,)
        return jnp.zeros((H,), f32).at[:b.shape[-1]].set(b.reshape(-1))

    wd1z = params["wd1"][:dim_h, :]
    wd1q = params["wd1"][dim_h:, :]

    # first-layer weights (degenerate K): pad N to 128, stack along K
    we1_p = jnp.zeros((dim_x + dim_yc, H), f32).at[:, :dim_h].set(params["we1"])
    wq1_p = jnp.zeros((dim_x, H), f32).at[:, :dim_h].set(params["wq1"])
    w_first = jnp.concatenate([we1_p, wq1_p], axis=0)            # (Kf, 128)
    kf = w_first.shape[0]

    w_slab = jnp.stack([padw(params["we2"]), padw(params["we3"]),
                        padw(params["wq2"]), padw(params["wq3"]),
                        padw(wd1z), padw(wd1q),
                        padw(params["wd2"]), padw(params["wd3"])])  # (8,128,128)
    b_slab = jnp.stack([padb(params["be1"]), padb(params["be2"]),
                        padb(params["be3"]), padb(params["bq1"]),
                        padb(params["bq2"]), padb(params["bq3"]),
                        padb(params["bd1"]), padb(params["bd2"]),
                        padb(params["bd3"])])                       # (9,128)

    # ---- fold batch into the row dimension ----------------------------------
    xcy = jnp.concatenate([xc, yc], axis=-1).reshape(B * Nc, dim_x + dim_yc)
    xt2 = xt.reshape(B * Nt, dim_x)

    # block-structured mean-pool + broadcast matrix (per batch-tile)
    row_b = jnp.arange(bt * Nt, dtype=jnp.int32) // Nt
    col_b = jnp.arange(bt * Nc, dtype=jnp.int32) // Nc
    comb = (row_b[:, None] == col_b[None, :]).astype(f32) / float(Nc)

    mc, mt = bt * Nc, bt * Nt
    in_specs = [
        pl.BlockSpec((mc, dim_x + dim_yc), lambda i: (i, 0)),
        pl.BlockSpec((mt, dim_x), lambda i: (i, 0)),
        pl.BlockSpec((mt, mc), lambda i: (0, 0)),
        pl.BlockSpec((kf, H), lambda i: (0, 0)),
        pl.BlockSpec((8, H, H), lambda i: (0, 0, 0)),
        pl.BlockSpec((9, H), lambda i: (0, 0)),
    ]
    out_spec = pl.BlockSpec((mt, H), lambda i: (i, 0))
    out_shape = jax.ShapeDtypeStruct((B * Nt, H), f32)

    fn = pl.pallas_call(
        cnp_kernel,
        out_shape=out_shape,
        grid_spec=pltpu.PrefetchScalarGridSpec(
            num_scalar_prefetch=0,
            grid=grid,
            in_specs=in_specs,
            out_specs=out_spec,
        ),
        compiler_params=pltpu.CompilerParams(
            dimension_semantics=("parallel",),
            vmem_limit_bytes=32 * 1024 * 1024,
        ),
    )
    out_full = fn(xcy, xt2, comb, w_first, w_slab, b_slab)   # (B*Nt, 128)
    return out_full[:, :dim_yt].reshape(B, Nt, dim_yt)


# -----------------------------------------------------------------------------
# Parameter init (deterministic, PyTorch-Linear-style uniform(-1/sqrt(fan_in)))
# -----------------------------------------------------------------------------
def init_params(key, dim_x, dim_yc, dim_yt, dim_h):
    def linear(key, din, dout):
        kw, kb = jax.random.split(key)
        bound = 1.0 / jnp.sqrt(jnp.float32(din))
        w = jax.random.uniform(kw, (din, dout), jnp.float32, -bound, bound)
        b = jax.random.uniform(kb, (1, dout), jnp.float32, -bound, bound)
        return w, b

    keys = jax.random.split(key, 9)
    p = {}
    p["we1"], p["be1"] = linear(keys[0], dim_x + dim_yc, dim_h)
    p["we2"], p["be2"] = linear(keys[1], dim_h, dim_h)
    p["we3"], p["be3"] = linear(keys[2], dim_h, dim_h)
    p["wq1"], p["bq1"] = linear(keys[3], dim_x, dim_h)
    p["wq2"], p["bq2"] = linear(keys[4], dim_h, dim_h)
    p["wq3"], p["bq3"] = linear(keys[5], dim_h, dim_h)
    p["wd1"], p["bd1"] = linear(keys[6], 2 * dim_h, dim_h)
    p["wd2"], p["bd2"] = linear(keys[7], dim_h, dim_yt)  # placeholder, fixed below
    p["wd2"], p["bd2"] = linear(keys[7], dim_h, dim_h)
    p["wd3"], p["bd3"] = linear(keys[8], dim_h, dim_yt)
    return p


# Plain-JAX reference (mirrors the PyTorch forward exactly).
def ref_forward(xc, yc, xt, p):
    relu = jax.nn.relu
    inp = jnp.concatenate([xc, yc], axis=-1)
    h = relu(inp @ p["we1"] + p["be1"])
    h = relu(h @ p["we2"] + p["be2"])
    h = h @ p["we3"] + p["be3"]
    lat = h.mean(axis=1, keepdims=True)
    q = relu(xt @ p["wq1"] + p["bq1"])
    q = relu(q @ p["wq2"] + p["bq2"])
    q = q @ p["wq3"] + p["bq3"]
    z = jnp.broadcast_to(lat, (xt.shape[0], xt.shape[1], lat.shape[-1]))
    d = jnp.concatenate([z, q], axis=-1)
    d = relu(d @ p["wd1"] + p["bd1"])
    d = relu(d @ p["wd2"] + p["bd2"])
    return d @ p["wd3"] + p["bd3"]


if __name__ == "__main__":
    dim_x, dim_yc, dim_yt, dim_h = 2, 1, 1, 32
    B, Nc, Nt = 2, 16, 8

    key = jax.random.PRNGKey(0)
    k_xc, k_yc, k_xt, k_p = jax.random.split(key, 4)
    xc = jax.random.normal(k_xc, (B, Nc, dim_x), jnp.float32)
    yc = jax.random.normal(k_yc, (B, Nc, dim_yc), jnp.float32)
    xt = jax.random.normal(k_xt, (B, Nt, dim_x), jnp.float32)
    params = init_params(k_p, dim_x, dim_yc, dim_yt, dim_h)

    out = cnp_forward(xc, yc, xt, params)
    out = jax.block_until_ready(out)

    ref = ref_forward(xc, yc, xt, params)
    assert out.shape == (B, Nt, dim_yt)
    assert jnp.allclose(out, ref, rtol=1e-3, atol=1e-3), "mismatch vs reference"

    # TODO(synk): bf16 matmul inputs (v6e/v7x) left off to keep f32 parity with
    # the PyTorch reference; flip weight/activation dtype to bf16 for more MXU
    # throughput once tolerance allows.
    print("KERNEL_OK")
</pallas_src>

<mosaic_0001>
module attributes {stable_mosaic.version = 11 : i64} {
  func.func @cnp_kernel(%arg0: i32, %arg1: memref<16x3xf32, #tpu.memory_space<vmem>>, %arg2: memref<8x2xf32, #tpu.memory_space<vmem>>, %arg3: memref<8x16xf32, #tpu.memory_space<vmem>>, %arg4: memref<5x128xf32, #tpu.memory_space<vmem>>, %arg5: memref<8x128x128xf32, #tpu.memory_space<vmem>>, %arg6: memref<9x128xf32, #tpu.memory_space<vmem>>, %arg7: memref<8x128xf32, #tpu.memory_space<vmem>>) attributes {dimension_semantics = [#tpu.dimension_semantics<parallel>], iteration_bounds = array<i64: 2>, scalar_prefetch = 0 : i64, scratch_operands = 0 : i64, tpu.core_type = #tpu.core_type<tc>, window_params = [{transform_indices = @transform_0, window_bounds = array<i64: 16, 3>}, {transform_indices = @transform_1, window_bounds = array<i64: 8, 2>}, {pipeline_mode = #tpu.pipeline_mode<synchronous>, transform_indices = @transform_2, window_bounds = array<i64: 8, 16>}, {pipeline_mode = #tpu.pipeline_mode<synchronous>, transform_indices = @transform_3, window_bounds = array<i64: 5, 128>}, {pipeline_mode = #tpu.pipeline_mode<synchronous>, transform_indices = @transform_4, window_bounds = array<i64: 8, 128, 128>}, {pipeline_mode = #tpu.pipeline_mode<synchronous>, transform_indices = @transform_5, window_bounds = array<i64: 9, 128>}, {transform_indices = @transform_6, window_bounds = array<i64: 8, 128>}]} {
    %c0 = arith.constant 0 : index
    %c0_0 = arith.constant 0 : index
    %0 = vector.load %arg1[%c0, %c0_0] : memref<16x3xf32, #tpu.memory_space<vmem>>, vector<16x3xf32>
    %c0_1 = arith.constant 0 : index
    %c0_2 = arith.constant 0 : index
    %1 = vector.load %arg2[%c0_1, %c0_2] : memref<8x2xf32, #tpu.memory_space<vmem>>, vector<8x2xf32>
    %c0_3 = arith.constant 0 : index
    %c0_4 = arith.constant 0 : index
    %2 = vector.load %arg3[%c0_3, %c0_4] : memref<8x16xf32, #tpu.memory_space<vmem>>, vector<8x16xf32>
    %c0_5 = arith.constant 0 : index
    %c0_6 = arith.constant 0 : index
    %3 = vector.load %arg4[%c0_5, %c0_6] : memref<5x128xf32, #tpu.memory_space<vmem>>, vector<5x128xf32>
    %4 = vector.extract_strided_slice %0 {offsets = [0, 0], sizes = [16, 1], strides = [1, 1]} : vector<16x3xf32> to vector<16x1xf32>
    %5 = vector.extract_strided_slice %3 {offsets = [0, 0], sizes = [1, 128], strides = [1, 1]} : vector<5x128xf32> to vector<1x128xf32>
    %6 = vector.broadcast %4 : vector<16x1xf32> to vector<16x128xf32>
    %7 = vector.broadcast %5 : vector<1x128xf32> to vector<16x128xf32>
    %8 = arith.mulf %6, %7 : vector<16x128xf32>
    %9 = vector.extract_strided_slice %0 {offsets = [0, 1], sizes = [16, 1], strides = [1, 1]} : vector<16x3xf32> to vector<16x1xf32>
    %10 = vector.extract_strided_slice %3 {offsets = [1, 0], sizes = [1, 128], strides = [1, 1]} : vector<5x128xf32> to vector<1x128xf32>
    %11 = vector.broadcast %9 : vector<16x1xf32> to vector<16x128xf32>
    %12 = vector.broadcast %10 : vector<1x128xf32> to vector<16x128xf32>
    %13 = arith.mulf %11, %12 : vector<16x128xf32>
    %14 = arith.addf %8, %13 : vector<16x128xf32>
    %15 = vector.extract_strided_slice %0 {offsets = [0, 2], sizes = [16, 1], strides = [1, 1]} : vector<16x3xf32> to vector<16x1xf32>
    %16 = vector.extract_strided_slice %3 {offsets = [2, 0], sizes = [1, 128], strides = [1, 1]} : vector<5x128xf32> to vector<1x128xf32>
    %17 = vector.broadcast %15 : vector<16x1xf32> to vector<16x128xf32>
    %18 = vector.broadcast %16 : vector<1x128xf32> to vector<16x128xf32>
    %19 = arith.mulf %17, %18 : vector<16x128xf32>
    %20 = arith.addf %14, %19 : vector<16x128xf32>
    %c0_7 = arith.constant 0 : index
    %c0_8 = arith.constant 0 : index
    %21 = vector.load %arg6[%c0_7, %c0_8] : memref<9x128xf32, #tpu.memory_space<vmem>>, vector<1x128xf32>
    %22 = vector.broadcast %21 : vector<1x128xf32> to vector<16x128xf32>
    %23 = arith.addf %20, %22 : vector<16x128xf32>
    %cst = arith.constant 0.000000e+00 : f32
    %24 = vector.broadcast %cst : f32 to vector<16x128xf32>
    %25 = arith.maximumf %23, %24 : vector<16x128xf32>
    %c0_9 = arith.constant 0 : index
    %c0_10 = arith.constant 0 : index
    %c0_11 = arith.constant 0 : index
    %26 = vector.load %arg5[%c0_9, %c0_10, %c0_11] : memref<8x128x128xf32, #tpu.memory_space<vmem>>, vector<1x128x128xf32>
    %27 = vector.shape_cast %26 : vector<1x128x128xf32> to vector<128x128xf32>
    %cst_12 = arith.constant dense<0.000000e+00> : vector<16x128xf32>
    %28 = tpu.matmul %25, %27, %cst_12 {dimension_numbers = #tpu.dot_dimension_numbers<[1], [0], [0], [1], [0, 0, 1, 1], [], []>} : vector<16x128xf32>, vector<128x128xf32>, vector<16x128xf32> -> vector<16x128xf32>
    %c1 = arith.constant 1 : index
    %c0_13 = arith.constant 0 : index
    %29 = vector.load %arg6[%c1, %c0_13] : memref<9x128xf32, #tpu.memory_space<vmem>>, vector<1x128xf32>
    %30 = vector.broadcast %29 : vector<1x128xf32> to vector<16x128xf32>
    %31 = arith.addf %28, %30 : vector<16x128xf32>
    %cst_14 = arith.constant 0.000000e+00 : f32
    %32 = vector.broadcast %cst_14 : f32 to vector<16x128xf32>
    %33 = arith.maximumf %31, %32 : vector<16x128xf32>
    %c1_15 = arith.constant 1 : index
    %c0_16 = arith.constant 0 : index
    %c0_17 = arith.constant 0 : index
    %34 = vector.load %arg5[%c1_15, %c0_16, %c0_17] : memref<8x128x128xf32, #tpu.memory_space<vmem>>, vector<1x128x128xf32>
    %35 = vector.shape_cast %34 : vector<1x128x128xf32> to vector<128x128xf32>
    %cst_18 = arith.constant dense<0.000000e+00> : vector<16x128xf32>
    %36 = tpu.matmul %33, %35, %cst_18 {dimension_numbers = #tpu.dot_dimension_numbers<[1], [0], [0], [1], [0, 0, 1, 1], [], []>} : vector<16x128xf32>, vector<128x128xf32>, vector<16x128xf32> -> vector<16x128xf32>
    %c2 = arith.constant 2 : index
    %c0_19 = arith.constant 0 : index
    %37 = vector.load %arg6[%c2, %c0_19] : memref<9x128xf32, #tpu.memory_space<vmem>>, vector<1x128xf32>
    %38 = vector.broadcast %37 : vector<1x128xf32> to vector<16x128xf32>
    %39 = arith.addf %36, %38 : vector<16x128xf32>
    %c4 = arith.constant 4 : index
    %c0_20 = arith.constant 0 : index
    %c0_21 = arith.constant 0 : index
    %40 = vector.load %arg5[%c4, %c0_20, %c0_21] : memref<8x128x128xf32, #tpu.memory_space<vmem>>, vector<1x128x128xf32>
    %41 = vector.shape_cast %40 : vector<1x128x128xf32> to vector<128x128xf32>
    %cst_22 = arith.constant dense<0.000000e+00> : vector<16x128xf32>
    %42 = tpu.matmul %39, %41, %cst_22 {dimension_numbers = #tpu.dot_dimension_numbers<[1], [0], [0], [1], [0, 0, 1, 1], [], []>} : vector<16x128xf32>, vector<128x128xf32>, vector<16x128xf32> -> vector<16x128xf32>
    %cst_23 = arith.constant dense<0.000000e+00> : vector<8x128xf32>
    %43 = tpu.matmul %2, %42, %cst_23 {dimension_numbers = #tpu.dot_dimension_numbers<[1], [0], [0], [1], [0, 0, 1, 1], [], []>} : vector<8x16xf32>, vector<16x128xf32>, vector<8x128xf32> -> vector<8x128xf32>
    %44 = vector.extract_strided_slice %1 {offsets = [0, 0], sizes = [8, 1], strides = [1, 1]} : vector<8x2xf32> to vector<8x1xf32>
    %45 = vector.extract_strided_slice %3 {offsets = [3, 0], sizes = [1, 128], strides = [1, 1]} : vector<5x128xf32> to vector<1x128xf32>
    %46 = vector.broadcast %44 : vector<8x1xf32> to vector<8x128xf32>
    %47 = vector.broadcast %45 : vector<1x128xf32> to vector<8x128xf32>
    %48 = arith.mulf %46, %47 : vector<8x128xf32>
    %49 = vector.extract_strided_slice %1 {offsets = [0, 1], sizes = [8, 1], strides = [1, 1]} : vector<8x2xf32> to vector<8x1xf32>
    %50 = vector.extract_strided_slice %3 {offsets = [4, 0], sizes = [1, 128], strides = [1, 1]} : vector<5x128xf32> to vector<1x128xf32>
    %51 = vector.broadcast %49 : vector<8x1xf32> to vector<8x128xf32>
    %52 = vector.broadcast %50 : vector<1x128xf32> to vector<8x128xf32>
    %53 = arith.mulf %51, %52 : vector<8x128xf32>
    %54 = arith.addf %48, %53 : vector<8x128xf32>
    %c3 = arith.constant 3 : index
    %c0_24 = arith.constant 0 : index
    %55 = vector.load %arg6[%c3, %c0_24] : memref<9x128xf32, #tpu.memory_space<vmem>>, vector<1x128xf32>
    %56 = vector.broadcast %55 : vector<1x128xf32> to vector<8x128xf32>
    %57 = arith.addf %54, %56 : vector<8x128xf32>
    %cst_25 = arith.constant 0.000000e+00 : f32
    %58 = vector.broadcast %cst_25 : f32 to vector<8x128xf32>
    %59 = arith.maximumf %57, %58 : vector<8x128xf32>
    %c2_26 = arith.constant 2 : index
    %c0_27 = arith.constant 0 : index
    %c0_28 = arith.constant 0 : index
    %60 = vector.load %arg5[%c2_26, %c0_27, %c0_28] : memref<8x128x128xf32, #tpu.memory_space<vmem>>, vector<1x128x128xf32>
    %61 = vector.shape_cast %60 : vector<1x128x128xf32> to vector<128x128xf32>
    %cst_29 = arith.constant dense<0.000000e+00> : vector<8x128xf32>
    %62 = tpu.matmul %59, %61, %cst_29 {dimension_numbers = #tpu.dot_dimension_numbers<[1], [0], [0], [1], [0, 0, 1, 1], [], []>} : vector<8x128xf32>, vector<128x128xf32>, vector<8x128xf32> -> vector<8x128xf32>
    %c4_30 = arith.constant 4 : index
    %c0_31 = arith.constant 0 : index
    %63 = vector.load %arg6[%c4_30, %c0_31] : memref<9x128xf32, #tpu.memory_space<vmem>>, vector<1x128xf32>
    %64 = vector.broadcast %63 : vector<1x128xf32> to vector<8x128xf32>
    %65 = arith.addf %62, %64 : vector<8x128xf32>
    %cst_32 = arith.constant 0.000000e+00 : f32
    %66 = vector.broadcast %cst_32 : f32 to vector<8x128xf32>
    %67 = arith.maximumf %65, %66 : vector<8x128xf32>
    %c3_33 = arith.constant 3 : index
    %c0_34 = arith.constant 0 : index
    %c0_35 = arith.constant 0 : index
    %68 = vector.load %arg5[%c3_33, %c0_34, %c0_35] : memref<8x128x128xf32, #tpu.memory_space<vmem>>, vector<1x128x128xf32>
    %69 = vector.shape_cast %68 : vector<1x128x128xf32> to vector<128x128xf32>
    %cst_36 = arith.constant dense<0.000000e+00> : vector<8x128xf32>
    %70 = tpu.matmul %67, %69, %cst_36 {dimension_numbers = #tpu.dot_dimension_numbers<[1], [0], [0], [1], [0, 0, 1, 1], [], []>} : vector<8x128xf32>, vector<128x128xf32>, vector<8x128xf32> -> vector<8x128xf32>
    %c5 = arith.constant 5 : index
    %c0_37 = arith.constant 0 : index
    %71 = vector.load %arg6[%c5, %c0_37] : memref<9x128xf32, #tpu.memory_space<vmem>>, vector<1x128xf32>
    %72 = vector.broadcast %71 : vector<1x128xf32> to vector<8x128xf32>
    %73 = arith.addf %70, %72 : vector<8x128xf32>
    %c5_38 = arith.constant 5 : index
    %c0_39 = arith.constant 0 : index
    %c0_40 = arith.constant 0 : index
    %74 = vector.load %arg5[%c5_38, %c0_39, %c0_40] : memref<8x128x128xf32, #tpu.memory_space<vmem>>, vector<1x128x128xf32>
    %75 = vector.shape_cast %74 : vector<1x128x128xf32> to vector<128x128xf32>
    %cst_41 = arith.constant dense<0.000000e+00> : vector<8x128xf32>
    %76 = tpu.matmul %73, %75, %cst_41 {dimension_numbers = #tpu.dot_dimension_numbers<[1], [0], [0], [1], [0, 0, 1, 1], [], []>} : vector<8x128xf32>, vector<128x128xf32>, vector<8x128xf32> -> vector<8x128xf32>
    %77 = arith.addf %76, %43 : vector<8x128xf32>
    %c6 = arith.constant 6 : index
    %c0_42 = arith.constant 0 : index
    %78 = vector.load %arg6[%c6, %c0_42] : memref<9x128xf32, #tpu.memory_space<vmem>>, vector<1x128xf32>
    %79 = vector.broadcast %78 : vector<1x128xf32> to vector<8x128xf32>
    %80 = arith.addf %77, %79 : vector<8x128xf32>
    %cst_43 = arith.constant 0.000000e+00 : f32
    %81 = vector.broadcast %cst_43 : f32 to vector<8x128xf32>
    %82 = arith.maximumf %80, %81 : vector<8x128xf32>
    %c6_44 = arith.constant 6 : index
    %c0_45 = arith.constant 0 : index
    %c0_46 = arith.constant 0 : index
    %83 = vector.load %arg5[%c6_44, %c0_45, %c0_46] : memref<8x128x128xf32, #tpu.memory_space<vmem>>, vector<1x128x128xf32>
    %84 = vector.shape_cast %83 : vector<1x128x128xf32> to vector<128x128xf32>
    %cst_47 = arith.constant dense<0.000000e+00> : vector<8x128xf32>
    %85 = tpu.matmul %82, %84, %cst_47 {dimension_numbers = #tpu.dot_dimension_numbers<[1], [0], [0], [1], [0, 0, 1, 1], [], []>} : vector<8x128xf32>, vector<128x128xf32>, vector<8x128xf32> -> vector<8x128xf32>
    %c7 = arith.constant 7 : index
    %c0_48 = arith.constant 0 : index
    %86 = vector.load %arg6[%c7, %c0_48] : memref<9x128xf32, #tpu.memory_space<vmem>>, vector<1x128xf32>
    %87 = vector.broadcast %86 : vector<1x128xf32> to vector<8x128xf32>
    %88 = arith.addf %85, %87 : vector<8x128xf32>
    %cst_49 = arith.constant 0.000000e+00 : f32
    %89 = vector.broadcast %cst_49 : f32 to vector<8x128xf32>
    %90 = arith.maximumf %88, %89 : vector<8x128xf32>
    %c7_50 = arith.constant 7 : index
    %c0_51 = arith.constant 0 : index
    %c0_52 = arith.constant 0 : index
    %91 = vector.load %arg5[%c7_50, %c0_51, %c0_52] : memref<8x128x128xf32, #tpu.memory_space<vmem>>, vector<1x128x128xf32>
    %92 = vector.shape_cast %91 : vector<1x128x128xf32> to vector<128x128xf32>
    %cst_53 = arith.constant dense<0.000000e+00> : vector<8x128xf32>
    %93 = tpu.matmul %90, %92, %cst_53 {dimension_numbers = #tpu.dot_dimension_numbers<[1], [0], [0], [1], [0, 0, 1, 1], [], []>} : vector<8x128xf32>, vector<128x128xf32>, vector<8x128xf32> -> vector<8x128xf32>
    %c8 = arith.constant 8 : index
    %c0_54 = arith.constant 0 : index
    %94 = vector.load %arg6[%c8, %c0_54] : memref<9x128xf32, #tpu.memory_space<vmem>>, vector<1x128xf32>
    %95 = vector.broadcast %94 : vector<1x128xf32> to vector<8x128xf32>
    %96 = arith.addf %93, %95 : vector<8x128xf32>
    %c0_55 = arith.constant 0 : index
    %c0_56 = arith.constant 0 : index
    %97 = vector.load %arg7[%c0_55, %c0_56] : memref<8x128xf32, #tpu.memory_space<vmem>>, vector<8x128xf32>
    tpu.vector_store %arg7[%c0_55, %c0_56], %96 {strides = array<i32>} : memref<8x128xf32, #tpu.memory_space<vmem>>, vector<8x128xf32>,
    return
  }
  func.func @transform_0(%arg0: i32) -> (i32, i32) {
    %c0_i32 = arith.constant 0 : i32
    %c0_i32_0 = arith.constant 0 : i32
    return %arg0, %c0_i32 : i32, i32
  }
  func.func @transform_1(%arg0: i32) -> (i32, i32) {
    %c0_i32 = arith.constant 0 : i32
    %c0_i32_0 = arith.constant 0 : i32
    return %arg0, %c0_i32 : i32, i32
  }
  func.func @transform_2(%arg0: i32) -> (i32, i32) {
    %c0_i32 = arith.constant 0 : i32
    %c0_i32_0 = arith.constant 0 : i32
    %c0_i32_1 = arith.constant 0 : i32
    return %c0_i32, %c0_i32_0 : i32, i32
  }
  func.func @transform_3(%arg0: i32) -> (i32, i32) {
    %c0_i32 = arith.constant 0 : i32
    %c0_i32_0 = arith.constant 0 : i32
    %c0_i32_1 = arith.constant 0 : i32
    return %c0_i32, %c0_i32_0 : i32, i32
  }
  func.func @transform_4(%arg0: i32) -> (i32, i32, i32) {
    %c0_i32 = arith.constant 0 : i32
    %c0_i32_0 = arith.constant 0 : i32
    %c0_i32_1 = arith.constant 0 : i32
    %c0_i32_2 = arith.constant 0 : i32
    return %c0_i32, %c0_i32_0, %c0_i32_1 : i32, i32, i32
  }
  func.func @transform_5(%arg0: i32) -> (i32, i32) {
    %c0_i32 = arith.constant 0 : i32
    %c0_i32_0 = arith.constant 0 : i32
    %c0_i32_1 = arith.constant 0 : i32
    return %c0_i32, %c0_i32_0 : i32, i32
  }
  func.func @transform_6(%arg0: i32) -> (i32, i32) {
    %c0_i32 = arith.constant 0 : i32
    %c0_i32_0 = arith.constant 0 : i32
    return %arg0, %c0_i32 : i32, i32
  }
}

</mosaic_0001>

<bundles_post_ra>
// kernel: tpu_custom_call.1
= control target key start
LH: loop header
LB: loop body
LE: loop exit
PB: predicated region body
PF: predicated region fallthrough
CT: control target
= control target key end

     0   :  { %11 = vsyncpa [#allocation3], 0  ;;  %s1169_s0 = inlined_call_operand.vmem [shape: f32[32,3], index: 0, kind: input, shape index: {}]   ;;  %s1170_s1 = inlined_call_operand.vmem [shape: f32[16,2], index: 1, kind: input, shape index: {}]   ;;  %s1171_s2 = inlined_call_operand.vmem [shape: f32[8,16], index: 2, kind: input, shape index: {}]   ;;  %s1172_s3 = inlined_call_operand.vmem [shape: f32[5,128], index: 3, kind: input, shape index: {}]   ;;  %s1173_s4 = inlined_call_operand.hbm [shape: f32[8,128,128], index: 4, kind: input, shape index: {}]   ;;  %s1174_s5 = inlined_call_operand.vmem [shape: f32[9,128], index: 5, kind: input, shape index: {}]   ;;  %s1175_s6 = inlined_call_operand.hbm [shape: f32[16,128], index: 6, kind: output, shape index: {}]  }
   0x1   :  { %12 = vsyncpa [#allocation4], 0 }
   0x2   :  { %14 = vsyncpa [#allocation4 + $0x1], 0  ;;  %s1027_s21 = smov 0   ;;  %s1029_s22 = smov 0  }
   0x3   :  { %s1031_s23 = smov 0   ;;  %s1033_s24 = smov 0  }
   0x4 LB: > { %s1048_s25 = sadd.s32 4294967295, %s984_s24   ;;  %s802_s26 = sadd.s32 4294967294, %s984_s24   ;;  %s984_s24 = sphi %s1033_s24, %s1181_s24   ;;  %s980_s23 = sphi %s1031_s23, %s1180_s23   ;;  %s976_s22 = sphi %s1029_s22, %s1179_s22   ;;  %s972_s21 = sphi %s1027_s21, %s1178_s21  }
   0x5   : > { %s1052_s27 = sadd.s32 1, %s984_s24   ;;  %s163_s28 = sadd.s32 1, %s980_s23 }
   0x6   : > { %s160_s29 = ssub.s32 %s984_s24, %s1052_s27  ;;  %p173_p0 = scmp.ne.s32.totalorder %s980_s23, %s976_s22 }
   0x7   : > { %p161_p1 = scmp.eq.s32.totalorder %s160_s29, 0  ;;  %p174_p2 = scmp.eq.s32.totalorder %s1048_s25, 1 }
   0x8   : > { %p179_p3 = scmp.ne.s32.totalorder %s976_s22, %s972_s21  ;;  %p180_p4 = scmp.eq.s32.totalorder %s802_s26, 1 }
   0x9   : > { %s1063_s30 = scalar_select %p161_p1, %s980_s23, %s163_s28  }
   0xa   : > { %p1065_p5 = por %p174_p2, %p173_p0  ;;  %p1069_p6 = por %p180_p4, %p179_p3 }
   0xb   : > { %p803_p7 = scmp.ge.s32.totalorder %s984_s24, 1  ;;  %p187_p8 = scmp.lt.s32.totalorder %s984_s24, 3 }
   0xc   : > { %p831_p9 = scmp.eq.s32.totalorder %s1048_s25, 0  ;;  %s204_s11 = sshll.u32 %s1173_s4, 4  ;;  %s205_s11 = int_to_ptr.hbm [resolvable:$true] %s204_s11 }
   0xd   : > { %p188_p10 = pnand %p803_p7, %p187_p8  ;;  %s986_s12 = smov [#allocation2]  }
   0xe   : > { %s206_s13 = sshll.u32 %s986_s12, 4  ;;  %s987_s14 = smov 128   ;;  %s207_s13 = int_to_ptr.vmem [resolvable:$true] %s206_s13 }
   0xf   : > { %p823_p11 = pneg %p188_p10  ;;  %s988_s15 = smov 8  }
  0x10   : > { %241 = sbr.rel (%p188_p10) target bundleno = 1265 (0x4f1), region = 44 }
  0x11   : > { %p824_p12 = pnand %p831_p9, %p823_p11 }
  0x13   : > { %826 = dma.hbm_to_vmem [thread:$0]  (!%p824_p12), %s205_s11, 16384, %s207_s13, [#allocation3], %s987_s14, %s987_s14, %s988_s15  }
  0x15   : > { %963 = dma.done.wait (%p831_p9), [#allocation3], 16384  }
  0x16   : > { %965 = vsyncadd (%p831_p9), [#allocation3], 4294950912  ;;  %s809_s16 = sshll.u32 %s1048_s25, 1  ;;  %v989_v0 = vmov 2   ;;  %v990_v1 = vmov 0   ;;  %v991_v2 = vmov 1  }
  0x17   : > { %874 = vset.pattern.permute.xlu1 %v989_v0  ;;  %872 = vset.pattern.permute.xlu0 %v990_v1  ;;  %p277_p13 = scmp.lt.s32.totalorder %s809_s16, 3  ;;  %p282_p0 = scmp.lt.s32.totalorder %s1048_s25, 1  ;;  %v351_v4 = vld [vmem:[#allocation2 + $0x78] sm:$0xff]  ;;  %v350_v6 = vld [vmem:[#allocation2 + $0x70] sm:$0xff]  ;;  %v349_v7 = vld [vmem:[#allocation2 + $0x68] sm:$0xff]  ;;  %vm461_vm0 = vcmask 130048  }
  0x18   : > { %876 = vset.pattern.permute.xlu2 %v991_v2  ;;  %354 = vmatpush.msra.mxu0 %v351_v4  ;;  %v348_v8 = vld [vmem:[#allocation2 + $0x60] sm:$0xff]  ;;  %v347_v9 = vld [vmem:[#allocation2 + $0x58] sm:$0xff]  ;;  %v346_v10 = vld [vmem:[#allocation2 + $0x50] sm:$0xff]  ;;  %s814_s18 = sshll.u32 %s1048_s25, 3 }
  0x19   : > { %s1183_s16 = smov (!%p277_p13, %s809_s16), 3  ;;  %v345_v12 = vld [vmem:[#allocation2 + $0x48] sm:$0xff]  ;;  %v344_v13 = vld [vmem:[#allocation2 + $0x40] sm:$0xff]  ;;  %v343_v14 = vld [vmem:[#allocation2 + $0x38] sm:$0xff] }
  0x1a   : > { %s810_s17 = sshll.u32 %s1183_s16, 3  ;;  %355 = vmatpush.msra.mxu0 %v350_v6  ;;  %v342_v15 = vld [vmem:[#allocation2 + $0x30] sm:$0xff]  ;;  %v341_v16 = vld [vmem:[#allocation2 + $0x28] sm:$0xff]  ;;  %v340_v17 = vld [vmem:[#allocation2 + $0x20] sm:$0xff]  ;;  %s273_s16 = sand.u32 1, %s976_s22  }
  0x1b   : > { %s280_s20 = scalar_lea.vmem %s1169_s0, %s810_s17  ;;  %v339_v18 = vld [vmem:[#allocation2 + $0x18] sm:$0xff]  ;;  %v338_v19 = vld [vmem:[#allocation2 + $0x10] sm:$0xff]  ;;  %v337_v20 = vld [vmem:[#allocation2 + $0x8] sm:$0xff]  ;;  %s808_s17 = sshll.u32 %s273_s16, 3 }
  0x1c   : > { %v286_v3 = vld [vmem:[%s280_s20] sm:$0xff]  ;;  %v287_v5 = vld [vmem:[%s280_s20 + $0x8] sm:$0xff]  ;;  %s283_s26 = scalar_select %p282_p0, %s1048_s25, 1  ;;  %356 = vmatpush.msra.mxu0 %v349_v7  ;;  %v395_v22 = vld [vmem:[#allocation2 + $0xf8] sm:$0xff] }
  0x1d   : > { %318 = vperm.xlu1 %874, %v286_v3   ;;  %293 = vperm.xlu0 %872, %v286_v3   ;;  %v336_v21 = vld [vmem:[#allocation2] sm:$0xff]  ;;  %v394_v23 = vld [vmem:[#allocation2 + $0xf0] sm:$0xff]  ;;  %v393_v24 = vld [vmem:[#allocation2 + $0xe8] sm:$0xff]  ;;  %s275_s9 = scalar_lea.vmem [#allocation5], %s808_s17  ;;  %s704_s12 = scalar_lea.sflag [#allocation4], %s273_s16 }
  0x1e   : > { %309 = vperm.xlu2 %876, %v287_v5   ;;  %357 = vmatpush.msra.mxu0 %v348_v8  ;;  %s811_s28 = sshll.u32 %s283_s26, 3  ;;  %v392_v27 = vld [vmem:[#allocation2 + $0xe0] sm:$0xff]  ;;  %v391_v28 = vld [vmem:[#allocation2 + $0xd8] sm:$0xff]  ;;  %v390_v31 = vld [vmem:[#allocation2 + $0xd0] sm:$0xff]  ;;  %s714_s26 = scalar_lea.hbm %s1175_s6, %s814_s18 }
  0x1f   : > { %s285_s10 = scalar_lea.vmem %s1170_s1, %s811_s28  ;;  %398 = vmatpush.msra.mxu1 %v395_v22  ;;  %v1097_v29 = vld [vmem:[%s1172_s3] sm:$0x1f]  ;;  %v389_v34 = vld [vmem:[#allocation2 + $0xc8] sm:$0xff]  ;;  %v387_v43 = vld [vmem:[#allocation2 + $0xb8] sm:$0xff]  ;;  %s718_s11 = sshll.u32 %s714_s26, 4  ;;  %s719_s11 = int_to_ptr.hbm [resolvable:$true] %s718_s11 }
  0x20   : > { %358 = vmatpush.msra.mxu0 %v347_v9  ;;  %v288_v11 = vld [vmem:[%s285_s10] sm:$0xff]  ;;  %v301_v32 = vperm.slane %v1097_v29, 0  ;;  %v312_v33 = vperm.slane %v1097_v29, 1  ;;  %v325_v35 = vperm.slane %v1097_v29, 2  ;;  %v386_v47 = vld [vmem:[#allocation2 + $0xb0] sm:$0xff]  ;;  %v385_v52 = vld [vmem:[#allocation2 + $0xa8] sm:$0xff] }
  0x21   : > { %399 = vmatpush.msra.mxu1 %v394_v23  ;;  %v388_v36 = vld [vmem:[#allocation2 + $0xc0] sm:$0xff]  ;;  %v383_v57 = vld [vmem:[#allocation2 + $0x98] sm:$0xff]  ;;  %v382_v60 = vld [vmem:[#allocation2 + $0x90] sm:$0xff]  ;;  %s716_s10 = sshll.u32 %s275_s9, 4  ;;  %s932_s13 = sshra.s32 %s719_s11, 4  ;;  %s717_s10 = int_to_ptr.vmem [resolvable:$true] %s716_s10  ;;  %s933_s13 = int_to_ptr.hbm [resolvable:$true] %s932_s13 }
  0x22   : > { %359 = vmatpush.msra.mxu0 %v346_v10  ;;  %v879_v46 = vld [vmem:[%s1174_s5] ss:$0 sm:$0xff]  ;;  %v381_v61 = vld [vmem:[#allocation2 + $0x88] sm:$0xff]  ;;  %v437_v63 = vld [vmem:[#allocation2 + $0x278] sm:$0xff]  ;;  %s934_s25 = scalar_lea.hbm %s933_s13, 8  ;;  %s938_s18 = scalar_lea.hbm %s1175_s6, 16 }
  0x23   : > { %400 = vmatpush.msra.mxu1 %v393_v24  ;;  %v384_v54 = vld [vmem:[#allocation2 + $0xa0] sm:$0xff]  ;;  %438 = vmatpush.msra.mxu2 %v437_v63  ;;  %v432_v4 = vld [vmem:[#allocation2 + $0x250] sm:$0xff]  ;;  %v429_v7 = vld [vmem:[#allocation2 + $0x238] sm:$0xff]  ;;  %p935_p1 = scmp.ne.s32.totalorder %s933_s13, %s934_s25  ;;  %p939_p4 = scmp.lt.s32.totalorder %s933_s13, %s1175_s6 }
  0x24   : > { %360 = vmatpush.msra.mxu0 %v345_v12  ;;  %v380_v62 = vld [vmem:[#allocation2 + $0x80] sm:$0xff]  ;;  %v428_v9 = vld [vmem:[#allocation2 + $0x230] sm:$0xff]  ;;  %v427_v10 = vld [vmem:[#allocation2 + $0x228] sm:$0xff]  ;;  %p940_p7 = scmp.lt.s32.totalorder %s938_s18, %s934_s25 }
  0x25   : > { %875 = vset.pattern.permute.xlu1 %v990_v1  ;;  %873 = vset.pattern.permute.xlu0 %v991_v2  ;;  %v435_v1 = vld [vmem:[#allocation2 + $0x268] sm:$0xff]  ;;  %v430_v6 = vld [vmem:[#allocation2 + $0x240] sm:$0xff]  ;;  %p936_p2 = pnand %p935_p1, %p1065_p5 }
  0x26   : > { %298 = vperm.xlu1 %875, %v287_v5   ;;  %305 = vperm.xlu0 %873, %v286_v3   ;;  %v433_v3 = vld [vmem:[#allocation2 + $0x258] sm:$0xff]  ;;  %v880_v8 = vld [vmem:[%s1174_s5 + $0x1] ss:$0 sm:$0xff]  ;;  %v881_v22 = vld [vmem:[%s1174_s5 + $0x2] ss:$0 sm:$0xff]  ;;  %p941_p8 = por %p940_p7, %p939_p4 }
  0x27   : > { %877 = vset.pattern.permute.xlu2 %v989_v0  ;;  %361 = vmatpush.msra.mxu0 %v344_v13  ;;  %v436_v0 = vld [vmem:[#allocation2 + $0x270] sm:$0xff]  ;;  %v426_v13 = vld [vmem:[#allocation2 + $0x220] sm:$0xff]  ;;  %p937_p3 = pneg %p936_p2 }
  0x28   : > { %322 = vperm.xlu2 %877, %v287_v5   ;;  %401 = vmatpush.msra.mxu1 %v392_v27  ;;  %v431_v5 = vld [vmem:[#allocation2 + $0x248] sm:$0xff]  ;;  %v504_v63 = vld [vmem:[#allocation2 + $0x100] sm:$0xff] }
  0x29   : > { %362 = vmatpush.msra.mxu0 %v343_v14  ;;  %439 = vmatpush.msra.mxu2 %v436_v0  ;;  %p942_p9 = pnand %p941_p8, %p937_p3 }
  0x2a   : > { %402 = vmatpush.msra.mxu1 %v391_v28 }
  0x2b   : > { %363 = vmatpush.msra.mxu0 %v342_v15  ;;  %440 = vmatpush.msra.mxu2 %v435_v1  ;;  %v425_v15 = vld [vmem:[#allocation2 + $0x218] sm:$0xff]  ;;  %v550_v1 = vld [vmem:[#allocation2 + $0x1b0] sm:$0xff] }
  0x2c   : > { %403 = vmatpush.msra.mxu1 %v390_v31  ;;  %v289_v31 = vld [vmem:[%s1171_s2] sm:$0xff] }
  0x2d   : > { %364 = vmatpush.msra.mxu0 %v341_v16  ;;  %v424_v16 = vld [vmem:[#allocation2 + $0x210] sm:$0xff] }
  0x2e   : > { %487 = vperm.xlu1 %875, %v288_v11   ;;  %404 = vmatpush.msra.mxu1 %v389_v34  ;;  %v558_v34 = vld [vmem:[#allocation2 + $0x1f0] sm:$0xff] }
  0x2f   : > { %365 = vmatpush.msra.mxu0 %v340_v17 }
  0x30   : > { %878 = vset.pattern.permute.xlu2 %v991_v2  ;;  %405 = vmatpush.msra.mxu1 %v388_v36  ;;  %v434_v2 = vld [vmem:[#allocation2 + $0x260] sm:$0xff]  ;;  %v557_v36 = vld [vmem:[#allocation2 + $0x1e8] sm:$0xff] }
  0x31   : > { %493 = vperm.xlu2 %878, %v288_v11   ;;  %366 = vmatpush.msra.mxu0 %v339_v18 }
  0x32   : > { %406 = vmatpush.msra.mxu1 %v387_v43  ;;  %441 = vmatpush.msra.mxu2 %v434_v2  ;;  %v513_v43 = vld [vmem:[#allocation2 + $0x148] sm:$0xff] }
  0x33   : > { %367 = vmatpush.msra.mxu0 %v338_v19  ;;  %v549_v2 = vld [vmem:[#allocation2 + $0x1a8] sm:$0xff] }
  0x34   : > { %407 = vmatpush.msra.mxu1 %v386_v47  ;;  %442 = vmatpush.msra.mxu2 %v433_v3  ;;  %v496_v47 = vperm.slane %v1097_v29, 4  ;;  %v548_v3 = vld [vmem:[#allocation2 + $0x1a0] sm:$0xff] }
  0x35   : > { %368 = vmatpush.msra.mxu0 %v337_v20  ;;  %v423_v20 = vld [vmem:[#allocation2 + $0x208] sm:$0xff] }
  0x36   : > { %408 = vmatpush.msra.mxu1 %v385_v52  ;;  %443 = vmatpush.msra.mxu2 %v432_v4  ;;  %v547_v4 = vld [vmem:[#allocation2 + $0x198] sm:$0xff] }
  0x37   : > { %369 = vmatpush.msra.mxu0 %v336_v21  ;;  %v422_v21 = vld [vmem:[#allocation2 + $0x200] sm:$0xff] }
  0x38   : > { %409 = vmatpush.msra.mxu1 %v384_v54  ;;  %444 = vmatpush.msra.mxu2 %v431_v5  ;;  %v546_v5 = vld [vmem:[#allocation2 + $0x190] sm:$0xff] }
  0x3a   : > { %410 = vmatpush.msra.mxu1 %v383_v57  ;;  %445 = vmatpush.msra.mxu2 %v430_v6  ;;  %v508_v57 = vld [vmem:[#allocation2 + $0x120] sm:$0xff]  ;;  %v545_v6 = vld [vmem:[#allocation2 + $0x188] sm:$0xff] }
  0x3c   : > { %411 = vmatpush.msra.mxu1 %v382_v60  ;;  %446 = vmatpush.msra.mxu2 %v429_v7  ;;  %v506_v60 = vld [vmem:[#allocation2 + $0x110] sm:$0xff]  ;;  %v544_v7 = vld [vmem:[#allocation2 + $0x180] sm:$0xff] }
  0x3e   : > { %412 = vmatpush.msra.mxu1 %v381_v61  ;;  %447 = vmatpush.msra.mxu2 %v428_v9  ;;  %v505_v61 = vld [vmem:[#allocation2 + $0x108] sm:$0xff]  ;;  %v597_v9 = vld [vmem:[#allocation2 + $0x2f0] sm:$0xff] }
  0x40   : > { %413 = vmatpush.msra.mxu1 %v380_v62  ;;  %448 = vmatpush.msra.mxu2 %v427_v10  ;;  %v596_v10 = vld [vmem:[#allocation2 + $0x2e8] sm:$0xff] }
  0x42   : > { %449 = vmatpush.msra.mxu2 %v426_v13  ;;  %v593_v13 = vld [vmem:[#allocation2 + $0x2d0] sm:$0xff] }
  0x44   : > { %450 = vmatpush.msra.mxu2 %v425_v15  ;;  %v591_v15 = vld [vmem:[#allocation2 + $0x2c0] sm:$0xff] }
  0x46   : > { %451 = vmatpush.msra.mxu2 %v424_v16  ;;  %v590_v16 = vld [vmem:[#allocation2 + $0x2b8] sm:$0xff] }
  0x48   : > { %452 = vmatpush.msra.mxu2 %v423_v20  ;;  %v587_v20 = vld [vmem:[#allocation2 + $0x2a0] sm:$0xff] }
  0x4a   : > { %453 = vmatpush.msra.mxu2 %v422_v21  ;;  %v586_v21 = vld [vmem:[#allocation2 + $0x298] sm:$0xff] }
  0x78   : > { %v310_v30 = vpop.permute.xlu2 %309 }
  0x79   : > { %v314_v40 = vmul.f32 %v312_v33, %v310_v30  ;;  %v519_v30 = vld [vmem:[#allocation2 + $0x178] sm:$0xff] }
  0x82   : > { %v323_v48 = vpop.permute.xlu2 %322 }
  0x83   : > { %v327_v49 = vmul.f32 %v325_v35, %v323_v48  ;;  %v490_v48 = vperm.slane %v1097_v29, 3  ;;  %v882_v29 = vld [vmem:[%s1174_s5 + $0x3] ss:$0 sm:$0xff] }
  0x8f   : > { %v294_v25 = vpop.permute.xlu0 %293  ;;  %v319_v26 = vpop.permute.xlu1 %318 }
  0x90   : > { %v302_v39 = vmul.f32 %v301_v32, %v294_v25  ;;  %v326_v44 = vmul.f32 %v325_v35, %v319_v26  ;;  %v517_v35 = vld [vmem:[#allocation2 + $0x168] sm:$0xff] }
  0x98   : > { %v299_v37 = vpop.permute.xlu1 %298  ;;  %v306_v38 = vpop.permute.xlu0 %305 }
  0x99   : > { %v303_v41 = vmul.f32 %v301_v32, %v299_v37  ;;  %v313_v42 = vmul.f32 %v312_v33, %v306_v38  ;;  %v518_v32 = vld [vmem:[#allocation2 + $0x170] sm:$0xff]  ;;  %v559_v33 = vld [vmem:[#allocation2 + $0x1f8] sm:$0xff]  ;;  %v516_v37 = vld [vmem:[#allocation2 + $0x160] sm:$0xff] }
  0x9a   : > { %562 = vmatpush.msrb.mxu0 %v559_v33  ;;  %v556_v38 = vld [vmem:[#allocation2 + $0x1e0] sm:$0xff] }
  0x9b   : > { %v315_v45 = vadd.f32 %v313_v42, %v302_v39  ;;  %v316_v50 = vadd.f32 %v314_v40, %v303_v41  ;;  %v515_v39 = vld [vmem:[#allocation2 + $0x158] sm:$0xff]  ;;  %v514_v41 = vld [vmem:[#allocation2 + $0x150] sm:$0xff]  ;;  %v636_v33 = vld [vmem:[#allocation2 + $0x360] sm:$0xff] }
  0x9c   : > { %563 = vmatpush.msrb.mxu0 %v558_v34  ;;  %v555_v40 = vld [vmem:[#allocation2 + $0x1d8] sm:$0xff]  ;;  %v554_v42 = vld [vmem:[#allocation2 + $0x1d0] sm:$0xff] }
  0x9d   : > { %v328_v51 = vadd.f32 %v326_v44, %v315_v45  ;;  %v329_v56 = vadd.f32 %v327_v49, %v316_v50  ;;  %v553_v44 = vld [vmem:[#allocation2 + $0x1c8] sm:$0xff]  ;;  %v512_v45 = vld [vmem:[#allocation2 + $0x140] sm:$0xff]  ;;  %v511_v49 = vld [vmem:[#allocation2 + $0x138] sm:$0xff] }
  0x9e   : > { %564 = vmatpush.msrb.mxu0 %v557_v36  ;;  %v551_v50 = vld [vmem:[#allocation2 + $0x1b8] sm:$0xff]  ;;  %v633_v36 = vld [vmem:[#allocation2 + $0x348] sm:$0xff] }
  0x9f   : > { %v332_v53 = vadd.f32 %v879_v46, %v328_v51  ;;  %v333_v58 = vadd.f32 %v879_v46, %v329_v56  ;;  %v552_v46 = vld [vmem:[#allocation2 + $0x1c0] sm:$0xff]  ;;  %v494_v51 = vpop.permute.xlu2 %493  ;;  %v509_v56 = vld [vmem:[#allocation2 + $0x128] sm:$0xff]  ;;  %v635_v34 = vld [vmem:[#allocation2 + $0x358] sm:$0xff] }
  0xa0   : > { %565 = vmatpush.msrb.mxu0 %v556_v38  ;;  %v488_v52 = vpop.permute.xlu1 %487  ;;  %v497_v54 = vmul.f32 %v496_v47, %v494_v51  ;;  %v631_v38 = vld [vmem:[#allocation2 + $0x338] sm:$0xff]  ;;  %v625_v47 = vld [vmem:[#allocation2 + $0x308] sm:$0xff] }
  0xa1   : > { %v334_v55 = vmax.f32 %v332_v53, 0.0  ;;  %v335_v59 = vmax.f32 %v333_v58, 0.0  ;;  %v510_v53 = vld [vmem:[#allocation2 + $0x130] sm:$0xff]  ;;  %v677_v51 = vld [vmem:[#allocation2 + $0x3e8] sm:$0xff] }
  0xa2   : > { %566 = vmatpush.msrb.mxu0 %v555_v40  ;;  %v629_v40 = vld [vmem:[#allocation2 + $0x328] sm:$0xff] }
  0xa3   : > { %370 = vmatmul.f32.vlgmr.msra.gmra.mxu0 %v334_v55  ;;  %v491_v55 = vmul.f32 %v490_v48, %v488_v52  ;;  %v624_v48 = vld [vmem:[#allocation2 + $0x300] sm:$0xff] }
  0xa4   : > { %567 = vmatpush.msrb.mxu0 %v554_v42  ;;  %v884_v42 = vld [vmem:[%s1174_s5 + $0x5] ss:$0 sm:$0xff] }
  0xa5   : > { %v498_v58 = vadd.f32 %v497_v54, %v491_v55  ;;  %v676_v52 = vld [vmem:[#allocation2 + $0x3e0] sm:$0xff]  ;;  %v674_v54 = vld [vmem:[#allocation2 + $0x3d0] sm:$0xff]  ;;  %v673_v55 = vld [vmem:[#allocation2 + $0x3c8] sm:$0xff] }
  0xa6   : > { %568 = vmatpush.msrb.mxu0 %v553_v44 }
  0xa7   : > { %v501_v62 = vadd.f32 %v882_v29, %v498_v58  ;;  %v670_v58 = vld [vmem:[#allocation2 + $0x3b0] sm:$0xff]  ;;  %v668_v29 = vld [vmem:[#allocation2 + $0x3a0] sm:$0xff] }
  0xa8   : > { %569 = vmatpush.msrb.mxu0 %v552_v46  ;;  %v626_v46 = vld [vmem:[#allocation2 + $0x310] sm:$0xff] }
  0xa9   : > { %v502_v0 = vmax.f32 %v501_v62, 0.0 }
  0xaa   : > { %570 = vmatpush.msrb.mxu0 %v551_v50  ;;  %v678_v50 = vld [vmem:[#allocation2 + $0x3f0] sm:$0xff] }
  0xab   : > { %373 = vmatmul.f32.gmra.mxu0 %v335_v59  ;;  %v507_v59 = vld [vmem:[#allocation2 + $0x118] sm:$0xff] }
  0xac   : > { %571 = vmatpush.msrb.mxu0 %v550_v1 }
  0xae   : > { %572 = vmatpush.msrb.mxu0 %v549_v2  ;;  %v666_v2 = vld [vmem:[#allocation2 + $0x390] sm:$0xff] }
  0xb0   : > { %573 = vmatpush.msrb.mxu0 %v548_v3  ;;  %v665_v3 = vld [vmem:[#allocation2 + $0x388] sm:$0xff] }
  0xb2   : > { %574 = vmatpush.msrb.mxu0 %v547_v4  ;;  %v664_v4 = vld [vmem:[#allocation2 + $0x380] sm:$0xff] }
  0xb4   : > { %575 = vmatpush.msrb.mxu0 %v546_v5  ;;  %v886_v5 = vld [vmem:[%s1174_s5 + $0x7] ss:$0 sm:$0xff] }
  0xb6   : > { %576 = vmatpush.msrb.mxu0 %v545_v6 }
  0xb8   : > { %577 = vmatpush.msrb.mxu0 %v544_v7 }
 0x120   : > { %v371_v11 = vpop.f32.mrf.mxu0 }
 0x121   : > { %v372_v12 = vadd.f32 %v880_v8, %v371_v11  ;;  %v595_v11 = vld [vmem:[#allocation2 + $0x2e0] sm:$0xff] }
 0x123   : > { %v377_v14 = vmax.f32 %v372_v12, 0.0  ;;  %v594_v12 = vld [vmem:[#allocation2 + $0x2d8] sm:$0xff] }
 0x125   : > { %414 = vmatmul.f32.vlgmr.msra.gmra.mxu1 %v377_v14  ;;  %v592_v14 = vld [vmem:[#allocation2 + $0x2c8] sm:$0xff] }
 0x128   : > { %v374_v17 = vpop.f32.mrf.mxu0 }
 0x129   : > { %v375_v18 = vadd.f32 %v880_v8, %v374_v17  ;;  %v598_v8 = vld [vmem:[#allocation2 + $0x2f8] sm:$0xff]  ;;  %v589_v17 = vld [vmem:[#allocation2 + $0x2b0] sm:$0xff] }
 0x12a   : > { %599 = vmatpush.msrb.mxu1 %v598_v8 }
 0x12b   : > { %v378_v19 = vmax.f32 %v375_v18, 0.0 }
 0x12c   : > { %600 = vmatpush.msrb.mxu1 %v597_v9  ;;  %v887_v9 = vld [vmem:[%s1174_s5 + $0x8] ss:$0 sm:$0xff] }
 0x12d   : > { %417 = vmatmul.f32.gmra.mxu1 %v378_v19  ;;  %v588_v19 = vld [vmem:[#allocation2 + $0x2a8] sm:$0xff] }
 0x12e   : > { %601 = vmatpush.msrb.mxu1 %v596_v10 }
 0x130   : > { %602 = vmatpush.msrb.mxu1 %v595_v11 }
 0x132   : > { %603 = vmatpush.msrb.mxu1 %v594_v12 }
 0x134   : > { %604 = vmatpush.msrb.mxu1 %v593_v13 }
 0x136   : > { %605 = vmatpush.msrb.mxu1 %v592_v14 }
 0x138   : > { %606 = vmatpush.msrb.mxu1 %v591_v15 }
 0x13a   : > { %607 = vmatpush.msrb.mxu1 %v590_v16 }
 0x13c   : > { %608 = vmatpush.msrb.mxu1 %v589_v17 }
 0x13e   : > { %609 = vmatpush.msrb.mxu1 %v588_v19 }
 0x140   : > { %610 = vmatpush.msrb.mxu1 %v587_v20 }
 0x142   : > { %611 = vmatpush.msrb.mxu1 %v586_v21 }
 0x1a2   : > { %v415_v23 = vpop.f32.mrf.mxu1 }
 0x1a3   : > { %v416_v24 = vadd.f32 %v881_v22, %v415_v23  ;;  %v585_v23 = vld [vmem:[#allocation2 + $0x290] sm:$0xff] }
 0x1a4   : > { %612 = vmatpush.msrb.mxu1 %v585_v23 }
 0x1a5   : > { %454 = vmatmul.f32.vlgmr.msra.gmra.mxu2 %v416_v24 }
 0x1aa   : > { %v418_v25 = vpop.f32.mrf.mxu1 }
 0x1ab   : > { %v419_v26 = vadd.f32 %v881_v22, %v418_v25  ;;  %v883_v22 = vld [vmem:[%s1174_s5 + $0x4] ss:$0 sm:$0xff] }
 0x1ad   : > { %457 = vmatmul.f32.gmra.mxu2 %v419_v26 }
 0x228   : > { %v455_v27 = vpop.f32.mrf.mxu2 }
 0x230   : > { %v458_v28 = vpop.f32.mrf.mxu2 }
 0x231   : > { %479 = vmatpush.msra.mxu3 %v458_v28  ;;  %v583_v28 = vld [vmem:[#allocation2 + $0x280] sm:$0xff] }
 0x233   : > { %480 = vmatpush.msra.mxu3 %v455_v27  ;;  %v584_v27 = vld [vmem:[#allocation2 + $0x288] sm:$0xff] }
 0x234   : > { %812 = vmatmul.msk.f32.vlgmr.msra.gmra.mxu3 %vm461_vm0, %v289_v31  ;;  %613 = vmatpush.msrb.mxu1 %v584_v27  ;;  %v638_v31 = vld [vmem:[#allocation2 + $0x370] sm:$0xff] }
 0x235   : > { %522 = vmatpush.msrb.mxu3 %v519_v30  ;;  %v639_v30 = vld [vmem:[#allocation2 + $0x378] sm:$0xff] }
 0x236   : > { %614 = vmatpush.msrb.mxu1 %v583_v28  ;;  %642 = vmatpush.msrb.mxu2 %v639_v30 }
 0x237   : > { %523 = vmatpush.msrb.mxu3 %v518_v32  ;;  %v637_v32 = vld [vmem:[#allocation2 + $0x368] sm:$0xff] }
 0x238   : > { %643 = vmatpush.msrb.mxu2 %v638_v31 }
 0x239   : > { %524 = vmatpush.msrb.mxu3 %v517_v35  ;;  %v634_v35 = vld [vmem:[#allocation2 + $0x350] sm:$0xff] }
 0x23a   : > { %644 = vmatpush.msrb.mxu2 %v637_v32 }
 0x23b   : > { %525 = vmatpush.msrb.mxu3 %v516_v37  ;;  %v632_v37 = vld [vmem:[#allocation2 + $0x340] sm:$0xff] }
 0x23c   : > { %645 = vmatpush.msrb.mxu2 %v636_v33 }
 0x23d   : > { %526 = vmatpush.msrb.mxu3 %v515_v39  ;;  %v630_v39 = vld [vmem:[#allocation2 + $0x330] sm:$0xff] }
 0x23e   : > { %646 = vmatpush.msrb.mxu2 %v635_v34 }
 0x23f   : > { %527 = vmatpush.msrb.mxu3 %v514_v41  ;;  %v628_v41 = vld [vmem:[#allocation2 + $0x320] sm:$0xff] }
 0x240   : > { %647 = vmatpush.msrb.mxu2 %v634_v35 }
 0x241   : > { %528 = vmatpush.msrb.mxu3 %v513_v43 }
 0x242   : > { %648 = vmatpush.msrb.mxu2 %v633_v36 }
 0x243   : > { %529 = vmatpush.msrb.mxu3 %v512_v45  ;;  %v627_v45 = vld [vmem:[#allocation2 + $0x318] sm:$0xff] }
 0x244   : > { %649 = vmatpush.msrb.mxu2 %v632_v37 }
 0x245   : > { %530 = vmatpush.msrb.mxu3 %v511_v49  ;;  %v679_v49 = vld [vmem:[#allocation2 + $0x3f8] sm:$0xff] }
 0x246   : > { %650 = vmatpush.msrb.mxu2 %v631_v38 }
 0x247   : > { %531 = vmatpush.msrb.mxu3 %v510_v53  ;;  %v675_v53 = vld [vmem:[#allocation2 + $0x3d8] sm:$0xff] }
 0x248   : > { %651 = vmatpush.msrb.mxu2 %v630_v39 }
 0x249   : > { %532 = vmatpush.msrb.mxu3 %v509_v56  ;;  %v672_v56 = vld [vmem:[#allocation2 + $0x3c0] sm:$0xff] }
 0x24a   : > { %652 = vmatpush.msrb.mxu2 %v629_v40 }
 0x24b   : > { %533 = vmatpush.msrb.mxu3 %v508_v57  ;;  %v671_v57 = vld [vmem:[#allocation2 + $0x3b8] sm:$0xff] }
 0x24c   : > { %653 = vmatpush.msrb.mxu2 %v628_v41 }
 0x24d   : > { %534 = vmatpush.msrb.mxu3 %v507_v59  ;;  %v669_v59 = vld [vmem:[#allocation2 + $0x3a8] sm:$0xff] }
 0x24e   : > { %654 = vmatpush.msrb.mxu2 %v627_v45 }
 0x24f   : > { %535 = vmatpush.msrb.mxu3 %v506_v60  ;;  %v667_v60 = vld [vmem:[#allocation2 + $0x398] sm:$0xff] }
 0x250   : > { %655 = vmatpush.msrb.mxu2 %v626_v46 }
 0x251   : > { %536 = vmatpush.msrb.mxu3 %v505_v61  ;;  %v885_v61 = vld [vmem:[%s1174_s5 + $0x6] ss:$0 sm:$0xff] }
 0x252   : > { %656 = vmatpush.msrb.mxu2 %v625_v47 }
 0x253   : > { %537 = vmatpush.msrb.mxu3 %v504_v63 }
 0x254   : > { %538 = vmatmul.f32.vlgmr.msrb.gmra.mxu3 %v502_v0  ;;  %657 = vmatpush.msrb.mxu2 %v624_v48 }
 0x255   : > { %682 = vmatpush.msra.mxu3 %v679_v49 }
 0x257   : > { %683 = vmatpush.msra.mxu3 %v678_v50 }
 0x259   : > { %684 = vmatpush.msra.mxu3 %v677_v51 }
 0x25b   : > { %685 = vmatpush.msra.mxu3 %v676_v52 }
 0x25d   : > { %686 = vmatpush.msra.mxu3 %v675_v53 }
 0x25f   : > { %687 = vmatpush.msra.mxu3 %v674_v54 }
 0x261   : > { %688 = vmatpush.msra.mxu3 %v673_v55 }
 0x263   : > { %689 = vmatpush.msra.mxu3 %v672_v56 }
 0x265   : > { %690 = vmatpush.msra.mxu3 %v671_v57 }
 0x267   : > { %691 = vmatpush.msra.mxu3 %v670_v58 }
 0x269   : > { %692 = vmatpush.msra.mxu3 %v669_v59 }
 0x26b   : > { %693 = vmatpush.msra.mxu3 %v668_v29 }
 0x26d   : > { %694 = vmatpush.msra.mxu3 %v667_v60 }
 0x26f   : > { %695 = vmatpush.msra.mxu3 %v666_v2 }
 0x271   : > { %696 = vmatpush.msra.mxu3 %v665_v3 }
 0x273   : > { %697 = vmatpush.msra.mxu3 %v664_v4 }
 0x2b7   : > { %v1119_v18 = vpop.f32.mrf.mxu3 }
 0x2d7   : > { %v539_v24 = vpop.f32.mrf.mxu3 }
 0x2d8   : > { %v540_v25 = vadd.f32 %v883_v22, %v539_v24 }
 0x2da   : > { %v542_v26 = vmax.f32 %v540_v25, 0.0 }
 0x2dc   : > { %578 = vmatmul.f32.vlgmr.msrb.gmra.mxu0 %v542_v26 }
 0x359   : > { %v579_v43 = vpop.f32.mrf.mxu0 }
 0x35a   : > { %v580_v44 = vadd.f32 %v884_v42, %v579_v43 }
 0x35c   : > { %615 = vmatmul.f32.vlgmr.msrb.gmra.mxu1 %v580_v44 }
 0x3d9   : > { %v616_v62 = vpop.f32.mrf.mxu1 }
 0x3da   : > { %v617_v63 = vadd.f32 %v616_v62, %v1119_v18 }
 0x3dc   : > { %v621_v0 = vadd.f32 %v885_v61, %v617_v63 }
 0x3de   : > { %v622_v1 = vmax.f32 %v621_v0, 0.0 }
 0x3e0   : > { %658 = vmatmul.f32.vlgmr.msrb.gmra.mxu2 %v622_v1 }
 0x463   : > { %v659_v6 = vpop.f32.mrf.mxu2 }
 0x464   : > { %v660_v7 = vadd.f32 %v886_v5, %v659_v6 }
 0x466   : > { %v662_v8 = vmax.f32 %v660_v7, 0.0 }
 0x468   : > { %698 = vmatmul.f32.vlgmr.msra.gmra.mxu3 %v662_v8 }
 0x4eb   : > { %v699_v10 = vpop.f32.mrf.mxu3 }
 0x4ec   : > { %v700_v11 = vadd.f32 %v887_v9, %v699_v10 }
 0x4ee   : > { %702 = vst [vmem:[%s275_s9] sm:$0xff] %v700_v11 }
 0x4ef   : > { %945 = shalt.err (!%p942_p9)
}
 0x4f0   : > { %821 = dma.vmem_to_hbm [thread:$0]  (%p1065_p5), %s717_s10, 128, %s719_s11, %s704_s12  }
 0x4f1 PF: > { %p833_p10 = scmp.ge.s32.totalorder %s984_s24, 2  ;;  %s730_s16 = sand.u32 1, %s972_s21  }
 0x4f2   : > { %s731_s20 = scalar_lea.sflag [#allocation4], %s730_s16 }
 0x4f3   : > { %p828_p11 = pnand %p833_p10, %p1069_p6 }
 0x4f5   : > { %p829_p12 = pneg %p828_p11 }
 0x4f7   : > { %967 = dma.done.wait (%p829_p12), %s731_s20, 128  }
 0x4f8   : > { %969 = vsyncadd (%p829_p12), %s731_s20, 4294967168  ;;  %p17_p13 = scmp.ge.s32.totalorder %s1052_s27, 4   ;;  %s1178_s21 = smov %s976_s22 }
 0x4f9   : > { %s1179_s22 = smov %s980_s23  ;;  %s1180_s23 = smov %s1063_s30 }
 0x4fa   : > { %s1181_s24 = smov %s1052_s27  ;;  %19 = sbr.rel (!%p17_p13) target bundleno = 4 (0x4), region = 94 }
 0x4ff   :  { %737 = vsyncpa [#allocation3], 1 }
 0x500   :  { %739 = vsyncpa [#allocation3 + $0x1], 1 }
 0x501   :  { %740 = vsyncpa [#allocation4], 1 }
 0x502   :  { %742 = vsyncpa [#allocation4 + $0x1], 1 }

</bundles_post_ra>
